<compile_context>
chip_gen: v7x
topology: tpu7x:2x2x1
jax: 0.10.0
libtpu: 0.0.40
codegen_flags: <defaults>
</compile_context>

<pallas_src>
import jax
import jax.numpy as jnp
from jax.experimental import pallas as pl
from jax.experimental.pallas import tpu as pltpu

_LANE = 128
_SUBLANE = 8


def _identity_kernel(q_ref, o_ref):
    # Pure copy: output tile <- input tile (output buffer aliases the input).
    o_ref[...] = q_ref[...]


def _vmem_capacity_bytes() -> int:
    """Physical VMEM per core; falls back to the smallest (v7x) if unknown."""
    try:
        return int(pltpu.get_tpu_info().vmem_capacity_bytes)
    except Exception:
        return 64 * 1024 * 1024


def _copy_2d(q2, per_buf_budget, vmem_limit, itemsize):
    """Aliased Pallas copy of a 2-D array, tiling rows by a VMEM budget."""
    rows, cols = q2.shape

    budget_rows = max(per_buf_budget // max(cols * itemsize, 1), 1)
    if rows <= budget_rows:
        tr = rows  # single block covering the full array -> always legal
    else:
        tr = max((budget_rows // _SUBLANE) * _SUBLANE, _SUBLANE)

    grid = (pl.cdiv(rows, tr),)

    return pl.pallas_call(
        _identity_kernel,
        out_shape=jax.ShapeDtypeStruct((rows, cols), q2.dtype),
        grid=grid,
        in_specs=[pl.BlockSpec((tr, cols), lambda i: (i, 0))],
        out_specs=pl.BlockSpec((tr, cols), lambda i: (i, 0)),
        input_output_aliases={0: 0},  # identity: let XLA reuse q's buffer
        compiler_params=pltpu.CompilerParams(
            dimension_semantics=("parallel",),
            vmem_limit_bytes=int(vmem_limit),
        ),
    )(q2)


def identity_forward(x, y, q, layer_id=0, fusion_net=None):
    """Pallas implementation of IdentityModule.forward: returns q."""
    del x, y, layer_id, fusion_net  # unused, as in the reference module

    orig_shape = q.shape
    orig_dtype = q.dtype
    total = int(q.size)
    if total == 0:
        return q

    itemsize = jnp.dtype(orig_dtype).itemsize
    vmem_cap = _vmem_capacity_bytes()
    # (in + out) x double buffering = 4 live tiles; keep each <= 1/16 of VMEM.
    per_buf_budget = max(vmem_cap // 16, 1 << 20)
    vmem_limit = min(vmem_cap * 3 // 4, 96 << 20)

    # ---- preferred: lane-dense flat 2-D layout [rows, cols], cols % 128 == 0 ----
    cols = None
    for w in (8192, 4096, 2048, 1024, 512, 256, 128):
        if total % w == 0:
            cols = w
            break

    if cols is not None:
        out2 = _copy_2d(q.reshape(-1, cols), per_buf_budget, vmem_limit, itemsize)
        return out2.reshape(orig_shape)

    # ---- small & lane-ragged: one whole-array block (always a legal shape) ----
    if total * itemsize <= per_buf_budget:
        out2 = _copy_2d(q.reshape(1, total), per_buf_budget, vmem_limit, itemsize)
        return out2.reshape(orig_shape)

    # ---- large & lane-ragged: tile the leading axis, keep trailing dims full ----
    # block last dim == full array dim, leading tile a multiple of 8 -> legal,
    # and avoids the extra HBM copy a pad/unpad round-trip would cost.
    shape = orig_shape if len(orig_shape) >= 2 else (1, total)
    for split in range(1, len(shape)):
        trailing = 1
        for d in shape[split:]:
            trailing *= int(d)
        leading = total // trailing
        if trailing * itemsize * _SUBLANE <= per_buf_budget and leading >= 1:
            out2 = _copy_2d(
                q.reshape(leading, trailing), per_buf_budget, vmem_limit, itemsize
            )
            return out2.reshape(orig_shape)

    # ---- last resort: pad flat view up to an (8,128) multiple ----
    pad = (-total) % (_SUBLANE * _LANE)
    qp = jnp.pad(q.reshape(-1), (0, pad)).reshape(-1, _SUBLANE * _LANE)
    out2 = _copy_2d(qp, per_buf_budget, vmem_limit, itemsize)
    return out2.reshape(-1)[:total].reshape(orig_shape)


if __name__ == "__main__":
    key = jax.random.PRNGKey(0)
    kx, ky, kq = jax.random.split(key, 3)

    # Small shapes consistent with a generic DNN fusion-block signature.
    x = jax.random.normal(kx, (2, 4, 16, 16), dtype=jnp.float32)
    y = jax.random.normal(ky, (2, 4, 16, 16), dtype=jnp.float32)
    q = jax.random.normal(kq, (2, 4, 16, 16), dtype=jnp.float32)

    out = identity_forward(x, y, q, layer_id=0, fusion_net=None)
    out = jax.block_until_ready(out)

    assert out.shape == q.shape and out.dtype == q.dtype
    assert jnp.array_equal(out, q), "Identity kernel did not reproduce q exactly"

    print("KERNEL_OK")
</pallas_src>

<mosaic_0001>
module attributes {stable_mosaic.version = 11 : i64} {
  func.func @_identity_kernel(%arg0: i32, %arg1: memref<1x2048xf32, #tpu.memory_space<vmem>>, %arg2: memref<1x2048xf32, #tpu.memory_space<vmem>>) attributes {dimension_semantics = [#tpu.dimension_semantics<parallel>], iteration_bounds = array<i64: 1>, scalar_prefetch = 0 : i64, scratch_operands = 0 : i64, tpu.core_type = #tpu.core_type<tc>, window_params = [{transform_indices = @transform_0, window_bounds = array<i64: 1, 2048>}, {transform_indices = @transform_1, window_bounds = array<i64: 1, 2048>}]} {
    %c0 = arith.constant 0 : index
    %c0_0 = arith.constant 0 : index
    %0 = vector.load %arg1[%c0, %c0_0] : memref<1x2048xf32, #tpu.memory_space<vmem>>, vector<1x2048xf32>
    %c0_1 = arith.constant 0 : index
    %c0_2 = arith.constant 0 : index
    %1 = vector.load %arg2[%c0_1, %c0_2] : memref<1x2048xf32, #tpu.memory_space<vmem>>, vector<1x2048xf32>
    tpu.vector_store %arg2[%c0_1, %c0_2], %0 {strides = array<i32>} : memref<1x2048xf32, #tpu.memory_space<vmem>>, vector<1x2048xf32>,
    return
  }
  func.func @transform_0(%arg0: i32) -> (i32, i32) {
    %c0_i32 = arith.constant 0 : i32
    %c0_i32_0 = arith.constant 0 : i32
    return %arg0, %c0_i32 : i32, i32
  }
  func.func @transform_1(%arg0: i32) -> (i32, i32) {
    %c0_i32 = arith.constant 0 : i32
    %c0_i32_0 = arith.constant 0 : i32
    return %arg0, %c0_i32 : i32, i32
  }
}

</mosaic_0001>

<bundles_post_ra>
// kernel: tpu_custom_call.1
= control target key start
LH: loop header
LB: loop body
LE: loop exit
PB: predicated region body
PF: predicated region fallthrough
CT: control target
= control target key end

     0   :  { %6 = vsyncpa [#allocation3], 0  ;;  %s126_s0 = inlined_call_operand.hbm [shape: f32[1,2048], index: 0, kind: input, shape index: {}, may-alias: {0,1}]   ;;  %s127_s1 = inlined_call_operand.hbm [shape: f32[1,2048], index: 1, kind: output, shape index: {}, may-alias: {0,1}]  }
   0x1   :  { %7 = vsyncpa [#allocation4], 0  ;;  %s90_s6 = smov [#allocation2]   ;;  %s42_s10 = scalar_lea.hbm %s126_s0, 256 }
   0x2   :  { %s14_s7 = sshll.u32 %s90_s6, 4  ;;  %p43_p0 = scmp.ne.s32.totalorder %s126_s0, %s42_s10  ;;  %s15_s7 = int_to_ptr.vmem [resolvable:$true] %s14_s7 }
   0x3   :  { %p46_p1 = scmp.lt.u32.totalorder %s42_s10, %s126_s0 }
   0x5   :  { %p48_p2 = pnand %p46_p1, %p43_p0 }
   0x7   :  { %51 = shalt.err (!%p48_p2)
}
   0x8   :  { %s52_s15 = scalar_lea.vmem %s15_s7, 256  ;;  %p57_p4 = scmp.lt.s32.totalorder %s15_s7, %s15_s7 }
   0x9   :  { %p53_p3 = scmp.ne.s32.totalorder %s15_s7, %s52_s15  ;;  %p58_p5 = scmp.lt.s32.totalorder %s52_s15, %s52_s15 }
   0xb   :  { %p59_p6 = por %p58_p5, %p57_p4 }
   0xd   :  { %p60_p7 = pnand %p59_p6, %p53_p3 }
   0xf   :  { %63 = shalt.err (!%p60_p7)
}
  0x10   :  { %17 = dma.hbm_to_vmem [thread:$0]  %s126_s0, 256, %s15_s7, [#allocation3]  }
  0x11   :  { %86 = dma.done.wait [#allocation3], 256  }
  0x12   :  { %87 = vsyncadd [#allocation3], 4294967040  ;;  %s91_s18 = smov [#allocation5]   ;;  %v21_v0 = vld [vmem:[#allocation2] sm:$0xff]  ;;  %v22_v1 = vld [vmem:[#allocation2 + $0x8] sm:$0xff] }
  0x13   :  { %s31_s19 = sshll.u32 %s91_s18, 4  ;;  %23 = vst [vmem:[#allocation5] sm:$0xff] %v21_v0  ;;  %24 = vst [vmem:[#allocation5 + $0x8] sm:$0xff] %v22_v1  ;;  %s32_s19 = int_to_ptr.vmem [resolvable:$true] %s31_s19 }
  0x14   :  { %s64_s20 = scalar_lea.vmem %s32_s19, 256  ;;  %p69_p9 = scmp.lt.s32.totalorder %s32_s19, %s32_s19 }
  0x15   :  { %p65_p8 = scmp.ne.s32.totalorder %s32_s19, %s64_s20  ;;  %p70_p10 = scmp.lt.s32.totalorder %s64_s20, %s64_s20 }
  0x17   :  { %p71_p11 = por %p70_p10, %p69_p9 }
  0x19   :  { %p72_p12 = pnand %p71_p11, %p65_p8 }
  0x1b   :  { %75 = shalt.err (!%p72_p12)
}
  0x1c   :  { %s76_s0 = scalar_lea.hbm %s127_s1, 256 }
  0x1d   :  { %p77_p13 = scmp.ne.s32.totalorder %s127_s1, %s76_s0  ;;  %p80_p0 = scmp.lt.u32.totalorder %s76_s0, %s127_s1 }
  0x1f   :  { %p82_p1 = pnand %p80_p0, %p77_p13 }
  0x21   :  { %85 = shalt.err (!%p82_p1)
}
  0x22   :  { %34 = dma.vmem_to_hbm [thread:$0]  %s32_s19, 256, %s127_s1, [#allocation4]  }
  0x23   :  { %88 = dma.done.wait [#allocation4], 256  }
  0x24   :  { %89 = vsyncadd [#allocation4], 4294967040 }
  0x25   :  { %38 = vsyncpa [#allocation3], 1 }
  0x26   :  { %39 = vsyncpa [#allocation4], 1 }

</bundles_post_ra>
